<compile_context>
chip_gen: v5e
topology: v5e:2x2
jax: 0.10.0
libtpu: 0.0.40
codegen_flags: <defaults>
</compile_context>

<pallas_src>
import math

import jax
import jax.numpy as jnp
from jax.experimental import pallas as pl
from jax.experimental.pallas import tpu as pltpu

NEG_INF = -1000000000.0  # matches torch masked_fill value


def attflat_kernel(x_ref, bias_ref, w1_ref, b1_ref, w2_ref, b2_ref,
                   wm_ref, bm_ref, out_ref):
    TB, Sp, H = x_ref.shape
    G = w2_ref.shape[1]
    cdt = x_ref.dtype                      # MXU compute dtype (bf16 or f32)

    x3 = x_ref[...]                        # (TB, Sp, H)
    x2 = x3.reshape(TB * Sp, H)            # row block for the MXU

    # MLP: Linear(H -> MID) + ReLU, Linear(MID -> G); f32 accumulation.
    h = jnp.dot(x2, w1_ref[...], preferred_element_type=jnp.float32) + b1_ref[...]
    h = jnp.maximum(h, 0.0)
    # TODO(synk): dropout (DROPOUT_R) omitted -- eval/inference semantics.
    att = (jnp.dot(h.astype(cdt), w2_ref[...], preferred_element_type=jnp.float32)
           + b2_ref[...] + bias_ref[...])  # (TB*Sp, G) f32, mask folded in

    # Softmax over the sequence axis (dim=1 in torch), per batch element.
    att3 = att.reshape(TB, Sp, G)
    att3 = att3 - jnp.max(att3, axis=1, keepdims=True)
    p = jnp.exp(att3)
    p = p * pl.reciprocal(jnp.sum(p, axis=1, keepdims=True), approx=True)

    # Glimpse-weighted sums over the sequence (VPU mul + sublane reduce keeps
    # the MXU free for the MLP/merge matmuls), then linear_merge batched
    # over TB rows.  Biases added once (outside the loop).
    x3f = x3.astype(jnp.float32)
    acc = jnp.zeros(out_ref.shape, jnp.float32)
    for g in range(G):                                    # static, G is 1-2
        xa = jnp.sum(p[:, :, g:g + 1] * x3f, axis=1)      # (TB, H) f32
        acc = acc + jnp.dot(xa.astype(cdt), wm_ref[g],
                            preferred_element_type=jnp.float32)  # (TB, OUT)
    out_ref[...] = (acc + bm_ref[...]).astype(out_ref.dtype)


def attflat(x, x_mask, params, *, compute_dtype=jnp.bfloat16, rows_target=256):
    """AttFlat forward.  x: (B,S,H); x_mask: (B,1,1,S) bool (True == masked)."""
    w1, b1, w2, b2, wm, bm = params
    B, S, H = x.shape
    MID = w1.shape[1]
    G = w2.shape[1]
    OUT = wm.shape[1]
    cdt = jnp.dtype(compute_dtype)

    # Pad S to the sublane tile so in-kernel reshapes are layout no-ops.
    sub = 8 * (4 // cdt.itemsize)
    Sp = pl.cdiv(S, sub) * sub

    # Additive mask bias (0 valid / -1e9 masked); padded positions masked.
    bias = jnp.where(x_mask[:, 0, 0, :], NEG_INF, 0.0).astype(jnp.float32)
    if Sp != S:
        bias = jnp.pad(bias, ((0, 0), (0, Sp - S)), constant_values=NEG_INF)
        x = jnp.pad(x, ((0, 0), (0, Sp - S), (0, 0)))

    # TB batch elements per grid step: target ~256 MXU rows (128 already
    # saturates a v5e pass) while keeping the batch block sublane-friendly.
    tb = max(1, rows_target // Sp)
    if tb >= B:
        tb = B
    else:
        tb = min(B, max(8, (tb // 8) * 8))
    # v7x megacore: keep >=2 grid steps when that still leaves >=128 rows.
    if pl.cdiv(B, tb) == 1 and tb >= 16 and (tb // 2) % 8 == 0 and (tb // 2) * Sp >= 128:
        tb //= 2

    Bp = pl.cdiv(B, tb) * tb
    if Bp != B:
        x = jnp.pad(x, ((0, Bp - B), (0, 0), (0, 0)))
        bias = jnp.pad(bias, ((0, Bp - B), (0, 0)), constant_values=NEG_INF)

    xc = x.astype(cdt)
    bias_flat = jnp.broadcast_to(bias[:, :, None], (Bp, Sp, G)).reshape(Bp * Sp, G)
    w1c = w1.astype(cdt)
    w2c = w2.astype(cdt)
    wmc = wm.reshape(G, H, OUT).astype(cdt)   # leading-dim glimpse split

    out = pl.pallas_call(
        attflat_kernel,
        out_shape=jax.ShapeDtypeStruct((Bp, OUT), jnp.float32),
        grid_spec=pltpu.PrefetchScalarGridSpec(
            num_scalar_prefetch=0,
            grid=(Bp // tb,),
            in_specs=[
                pl.BlockSpec((tb, Sp, H), lambda b: (b, 0, 0)),     # x
                pl.BlockSpec((tb * Sp, G), lambda b: (b, 0)),       # mask bias
                pl.BlockSpec((H, MID), lambda b: (0, 0)),           # w1
                pl.BlockSpec((1, MID), lambda b: (0, 0)),           # b1
                pl.BlockSpec((MID, G), lambda b: (0, 0)),           # w2
                pl.BlockSpec((1, G), lambda b: (0, 0)),             # b2
                pl.BlockSpec((G, H, OUT), lambda b: (0, 0, 0)),     # wm (split)
                pl.BlockSpec((1, OUT), lambda b: (0, 0)),           # bm
            ],
            out_specs=pl.BlockSpec((tb, OUT), lambda b: (b, 0)),
        ),
        compiler_params=pltpu.CompilerParams(
            dimension_semantics=("parallel",),
            vmem_limit_bytes=64 * 1024 * 1024),
    )(xc, bias_flat, w1c, b1, w2c, b2, wmc, bm)
    return out[:B]


def attflat_ref(x, x_mask, params):
    """Pure-JAX f32 reference mirroring the PyTorch forward."""
    w1, b1, w2, b2, wm, bm = params
    att = jnp.maximum(x @ w1 + b1, 0.0) @ w2 + b2          # (B, S, G)
    m = x_mask[:, 0, 0, :][..., None]                      # (B, S, 1) bool
    att = jnp.where(m, NEG_INF, att)
    att = jax.nn.softmax(att, axis=1)
    x_atted = jnp.einsum('bsg,bsh->bgh', att, x).reshape(x.shape[0], -1)
    return x_atted @ wm + bm


def init_params(key, H, MID, G, OUT):
    """Deterministic nn.Linear-style init (uniform +/- 1/sqrt(fan_in))."""
    ks = jax.random.split(key, 6)

    def lin(kw, kb, fan_in, fan_out):
        bound = 1.0 / math.sqrt(fan_in)
        w = jax.random.uniform(kw, (fan_in, fan_out), jnp.float32, -bound, bound)
        b = jax.random.uniform(kb, (1, fan_out), jnp.float32, -bound, bound)
        return w, b

    w1, b1 = lin(ks[0], ks[1], H, MID)      # mlp.fc.linear
    w2, b2 = lin(ks[2], ks[3], MID, G)      # mlp.linear
    wm, bm = lin(ks[4], ks[5], G * H, OUT)  # linear_merge
    return (w1, b1, w2, b2, wm, bm)


if __name__ == "__main__":
    # Small config consistent with AttFlat:
    # HIDDEN_SIZE=32, FLAT_MLP_SIZE=32, FLAT_GLIMPSES=2, FLAT_OUT_SIZE=64
    B, S, H, MID, G, OUT = 2, 8, 32, 32, 2, 64

    key = jax.random.PRNGKey(0)
    kx, kp = jax.random.split(key)
    x = jax.random.normal(kx, (B, S, H), jnp.float32)

    # x_mask[b, 0, 0, s] == True means position s of batch b is padding.
    lengths = jnp.array([S, 5], dtype=jnp.int32)
    x_mask = (jnp.arange(S)[None, :] >= lengths[:, None])[:, None, None, :]

    params = init_params(kp, H, MID, G, OUT)
    ref = attflat_ref(x, x_mask, params)

    # f32 path: numerically faithful to the PyTorch module (only the EUP
    # approx reciprocal in the softmax differs from an exact divide).
    out_f32 = jax.block_until_ready(
        attflat(x, x_mask, params, compute_dtype=jnp.float32))
    assert out_f32.shape == (B, OUT), out_f32.shape
    assert jnp.allclose(out_f32, ref, rtol=5e-3, atol=5e-3), (
        float(jnp.max(jnp.abs(out_f32 - ref))))

    # bf16 path: production setting (bf16 MXU inputs, f32 accumulation).
    out_bf16 = jax.block_until_ready(
        attflat(x, x_mask, params, compute_dtype=jnp.bfloat16))
    assert out_bf16.shape == (B, OUT), out_bf16.shape
    assert jnp.allclose(out_bf16, ref, rtol=3e-2, atol=3e-2), (
        float(jnp.max(jnp.abs(out_bf16 - ref))))

    print("KERNEL_OK")
</pallas_src>

<mosaic_0001>
module attributes {stable_mosaic.version = 11 : i64} {
  func.func @attflat_kernel(%arg0: i32, %arg1: memref<2x8x32xf32, #tpu.memory_space<vmem>>, %arg2: memref<16x2xf32, #tpu.memory_space<vmem>>, %arg3: memref<32x32xf32, #tpu.memory_space<vmem>>, %arg4: memref<1x32xf32, #tpu.memory_space<vmem>>, %arg5: memref<32x2xf32, #tpu.memory_space<vmem>>, %arg6: memref<1x2xf32, #tpu.memory_space<vmem>>, %arg7: memref<2x32x64xf32, #tpu.memory_space<vmem>>, %arg8: memref<1x64xf32, #tpu.memory_space<vmem>>, %arg9: memref<2x64xf32, #tpu.memory_space<vmem>>) attributes {dimension_semantics = [#tpu.dimension_semantics<parallel>], iteration_bounds = array<i64: 1>, scalar_prefetch = 0 : i64, scratch_operands = 0 : i64, tpu.core_type = #tpu.core_type<tc>, window_params = [{transform_indices = @transform_0, window_bounds = array<i64: 2, 8, 32>}, {transform_indices = @transform_1, window_bounds = array<i64: 16, 2>}, {pipeline_mode = #tpu.pipeline_mode<synchronous>, transform_indices = @transform_2, window_bounds = array<i64: 32, 32>}, {pipeline_mode = #tpu.pipeline_mode<synchronous>, transform_indices = @transform_3, window_bounds = array<i64: 1, 32>}, {pipeline_mode = #tpu.pipeline_mode<synchronous>, transform_indices = @transform_4, window_bounds = array<i64: 32, 2>}, {pipeline_mode = #tpu.pipeline_mode<synchronous>, transform_indices = @transform_5, window_bounds = array<i64: 1, 2>}, {pipeline_mode = #tpu.pipeline_mode<synchronous>, transform_indices = @transform_6, window_bounds = array<i64: 2, 32, 64>}, {pipeline_mode = #tpu.pipeline_mode<synchronous>, transform_indices = @transform_7, window_bounds = array<i64: 1, 64>}, {transform_indices = @transform_8, window_bounds = array<i64: 2, 64>}]} {
    %c0 = arith.constant 0 : index
    %c0_0 = arith.constant 0 : index
    %c0_1 = arith.constant 0 : index
    %0 = vector.load %arg1[%c0, %c0_0, %c0_1] : memref<2x8x32xf32, #tpu.memory_space<vmem>>, vector<2x8x32xf32>
    %1 = vector.shape_cast %0 : vector<2x8x32xf32> to vector<16x32xf32>
    %c0_2 = arith.constant 0 : index
    %c0_3 = arith.constant 0 : index
    %2 = vector.load %arg3[%c0_2, %c0_3] : memref<32x32xf32, #tpu.memory_space<vmem>>, vector<32x32xf32>
    %cst = arith.constant dense<0.000000e+00> : vector<16x32xf32>
    %3 = tpu.matmul %1, %2, %cst {dimension_numbers = #tpu.dot_dimension_numbers<[1], [0], [0], [1], [0, 0, 1, 1], [], []>} : vector<16x32xf32>, vector<32x32xf32>, vector<16x32xf32> -> vector<16x32xf32>
    %c0_4 = arith.constant 0 : index
    %c0_5 = arith.constant 0 : index
    %4 = vector.load %arg4[%c0_4, %c0_5] : memref<1x32xf32, #tpu.memory_space<vmem>>, vector<1x32xf32>
    %5 = vector.broadcast %4 : vector<1x32xf32> to vector<16x32xf32>
    %6 = arith.addf %3, %5 : vector<16x32xf32>
    %cst_6 = arith.constant 0.000000e+00 : f32
    %7 = vector.broadcast %cst_6 : f32 to vector<16x32xf32>
    %8 = arith.maximumf %6, %7 : vector<16x32xf32>
    %c0_7 = arith.constant 0 : index
    %c0_8 = arith.constant 0 : index
    %9 = vector.load %arg5[%c0_7, %c0_8] : memref<32x2xf32, #tpu.memory_space<vmem>>, vector<32x2xf32>
    %cst_9 = arith.constant dense<0.000000e+00> : vector<16x2xf32>
    %10 = tpu.matmul %8, %9, %cst_9 {dimension_numbers = #tpu.dot_dimension_numbers<[1], [0], [0], [1], [0, 0, 1, 1], [], []>} : vector<16x32xf32>, vector<32x2xf32>, vector<16x2xf32> -> vector<16x2xf32>
    %c0_10 = arith.constant 0 : index
    %c0_11 = arith.constant 0 : index
    %11 = vector.load %arg6[%c0_10, %c0_11] : memref<1x2xf32, #tpu.memory_space<vmem>>, vector<1x2xf32>
    %12 = vector.broadcast %11 : vector<1x2xf32> to vector<16x2xf32>
    %13 = arith.addf %10, %12 : vector<16x2xf32>
    %c0_12 = arith.constant 0 : index
    %c0_13 = arith.constant 0 : index
    %14 = vector.load %arg2[%c0_12, %c0_13] : memref<16x2xf32, #tpu.memory_space<vmem>>, vector<16x2xf32>
    %15 = arith.addf %13, %14 : vector<16x2xf32>
    %16 = vector.shape_cast %15 : vector<16x2xf32> to vector<2x8x2xf32>
    %cst_14 = arith.constant dense<0xFF800000> : vector<2x2xf32>
    %17 = vector.multi_reduction <maximumf>, %16, %cst_14 [1] : vector<2x8x2xf32> to vector<2x2xf32>
    %18 = vector.shape_cast %17 : vector<2x2xf32> to vector<2x1x2xf32>
    %19 = vector.broadcast %18 : vector<2x1x2xf32> to vector<2x8x2xf32>
    %20 = arith.subf %16, %19 : vector<2x8x2xf32>
    %21 = math.exp %20 : vector<2x8x2xf32>
    %cst_15 = arith.constant dense<0.000000e+00> : vector<2x2xf32>
    %22 = vector.multi_reduction <add>, %21, %cst_15 [1] : vector<2x8x2xf32> to vector<2x2xf32>
    %23 = vector.shape_cast %22 : vector<2x2xf32> to vector<2x1x2xf32>
    %24 = tpu.reciprocal %23 {approx = true} : vector<2x1x2xf32> -> vector<2x1x2xf32>
    %25 = vector.broadcast %24 : vector<2x1x2xf32> to vector<2x8x2xf32>
    %26 = arith.mulf %21, %25 : vector<2x8x2xf32>
    %cst_16 = arith.constant 0.000000e+00 : f32
    %27 = vector.broadcast %cst_16 : f32 to vector<2x64xf32>
    %28 = vector.extract_strided_slice %26 {offsets = [0, 0, 0], sizes = [2, 8, 1], strides = [1, 1, 1]} : vector<2x8x2xf32> to vector<2x8x1xf32>
    %29 = vector.broadcast %28 : vector<2x8x1xf32> to vector<2x8x32xf32>
    %30 = arith.mulf %29, %0 : vector<2x8x32xf32>
    %cst_17 = arith.constant dense<0.000000e+00> : vector<2x32xf32>
    %31 = vector.multi_reduction <add>, %30, %cst_17 [1] : vector<2x8x32xf32> to vector<2x32xf32>
    %c0_18 = arith.constant 0 : index
    %c0_19 = arith.constant 0 : index
    %c0_20 = arith.constant 0 : index
    %32 = vector.load %arg7[%c0_18, %c0_19, %c0_20] : memref<2x32x64xf32, #tpu.memory_space<vmem>>, vector<1x32x64xf32>
    %33 = vector.shape_cast %32 : vector<1x32x64xf32> to vector<32x64xf32>
    %cst_21 = arith.constant dense<0.000000e+00> : vector<2x64xf32>
    %34 = tpu.matmul %31, %33, %cst_21 {dimension_numbers = #tpu.dot_dimension_numbers<[1], [0], [0], [1], [0, 0, 1, 1], [], []>} : vector<2x32xf32>, vector<32x64xf32>, vector<2x64xf32> -> vector<2x64xf32>
    %35 = arith.addf %27, %34 : vector<2x64xf32>
    %36 = vector.extract_strided_slice %26 {offsets = [0, 0, 1], sizes = [2, 8, 1], strides = [1, 1, 1]} : vector<2x8x2xf32> to vector<2x8x1xf32>
    %37 = vector.broadcast %36 : vector<2x8x1xf32> to vector<2x8x32xf32>
    %38 = arith.mulf %37, %0 : vector<2x8x32xf32>
    %cst_22 = arith.constant dense<0.000000e+00> : vector<2x32xf32>
    %39 = vector.multi_reduction <add>, %38, %cst_22 [1] : vector<2x8x32xf32> to vector<2x32xf32>
    %c1 = arith.constant 1 : index
    %c0_23 = arith.constant 0 : index
    %c0_24 = arith.constant 0 : index
    %40 = vector.load %arg7[%c1, %c0_23, %c0_24] : memref<2x32x64xf32, #tpu.memory_space<vmem>>, vector<1x32x64xf32>
    %41 = vector.shape_cast %40 : vector<1x32x64xf32> to vector<32x64xf32>
    %cst_25 = arith.constant dense<0.000000e+00> : vector<2x64xf32>
    %42 = tpu.matmul %39, %41, %cst_25 {dimension_numbers = #tpu.dot_dimension_numbers<[1], [0], [0], [1], [0, 0, 1, 1], [], []>} : vector<2x32xf32>, vector<32x64xf32>, vector<2x64xf32> -> vector<2x64xf32>
    %43 = arith.addf %35, %42 : vector<2x64xf32>
    %c0_26 = arith.constant 0 : index
    %c0_27 = arith.constant 0 : index
    %44 = vector.load %arg8[%c0_26, %c0_27] : memref<1x64xf32, #tpu.memory_space<vmem>>, vector<1x64xf32>
    %45 = vector.broadcast %44 : vector<1x64xf32> to vector<2x64xf32>
    %46 = arith.addf %43, %45 : vector<2x64xf32>
    %c0_28 = arith.constant 0 : index
    %c0_29 = arith.constant 0 : index
    %47 = vector.load %arg9[%c0_28, %c0_29] : memref<2x64xf32, #tpu.memory_space<vmem>>, vector<2x64xf32>
    tpu.vector_store %arg9[%c0_28, %c0_29], %46 {strides = array<i32>} : memref<2x64xf32, #tpu.memory_space<vmem>>, vector<2x64xf32>,
    return
  }
  func.func @transform_0(%arg0: i32) -> (i32, i32, i32) {
    %c0_i32 = arith.constant 0 : i32
    %c0_i32_0 = arith.constant 0 : i32
    %c0_i32_1 = arith.constant 0 : i32
    return %arg0, %c0_i32, %c0_i32_0 : i32, i32, i32
  }
  func.func @transform_1(%arg0: i32) -> (i32, i32) {
    %c0_i32 = arith.constant 0 : i32
    %c0_i32_0 = arith.constant 0 : i32
    return %arg0, %c0_i32 : i32, i32
  }
  func.func @transform_2(%arg0: i32) -> (i32, i32) {
    %c0_i32 = arith.constant 0 : i32
    %c0_i32_0 = arith.constant 0 : i32
    %c0_i32_1 = arith.constant 0 : i32
    return %c0_i32, %c0_i32_0 : i32, i32
  }
  func.func @transform_3(%arg0: i32) -> (i32, i32) {
    %c0_i32 = arith.constant 0 : i32
    %c0_i32_0 = arith.constant 0 : i32
    %c0_i32_1 = arith.constant 0 : i32
    return %c0_i32, %c0_i32_0 : i32, i32
  }
  func.func @transform_4(%arg0: i32) -> (i32, i32) {
    %c0_i32 = arith.constant 0 : i32
    %c0_i32_0 = arith.constant 0 : i32
    %c0_i32_1 = arith.constant 0 : i32
    return %c0_i32, %c0_i32_0 : i32, i32
  }
  func.func @transform_5(%arg0: i32) -> (i32, i32) {
    %c0_i32 = arith.constant 0 : i32
    %c0_i32_0 = arith.constant 0 : i32
    %c0_i32_1 = arith.constant 0 : i32
    return %c0_i32, %c0_i32_0 : i32, i32
  }
  func.func @transform_6(%arg0: i32) -> (i32, i32, i32) {
    %c0_i32 = arith.constant 0 : i32
    %c0_i32_0 = arith.constant 0 : i32
    %c0_i32_1 = arith.constant 0 : i32
    %c0_i32_2 = arith.constant 0 : i32
    return %c0_i32, %c0_i32_0, %c0_i32_1 : i32, i32, i32
  }
  func.func @transform_7(%arg0: i32) -> (i32, i32) {
    %c0_i32 = arith.constant 0 : i32
    %c0_i32_0 = arith.constant 0 : i32
    %c0_i32_1 = arith.constant 0 : i32
    return %c0_i32, %c0_i32_0 : i32, i32
  }
  func.func @transform_8(%arg0: i32) -> (i32, i32) {
    %c0_i32 = arith.constant 0 : i32
    %c0_i32_0 = arith.constant 0 : i32
    return %arg0, %c0_i32 : i32, i32
  }
}

</mosaic_0001>

<bundles_post_ra>
// kernel: tpu_custom_call.1
= control target key start
LH: loop header
LB: loop body
LE: loop exit
PB: predicated region body
PF: predicated region fallthrough
CT: control target
= control target key end

     0   :  { %13 = vsyncpa [#allocation3], 0  ;;  %s506_s0 = inlined_call_operand.vmem [shape: f32[2,8,32], index: 0, kind: input, shape index: {}]   ;;  %s507_s1 = inlined_call_operand.vmem [shape: f32[16,2], index: 1, kind: input, shape index: {}]   ;;  %s508_s2 = inlined_call_operand.vmem [shape: f32[32,32], index: 2, kind: input, shape index: {}]   ;;  %s509_s3 = inlined_call_operand.vmem [shape: f32[1,32], index: 3, kind: input, shape index: {}]   ;;  %s510_s4 = inlined_call_operand.vmem [shape: f32[32,2], index: 4, kind: input, shape index: {}]   ;;  %s511_s5 = inlined_call_operand.vmem [shape: f32[1,2], index: 5, kind: input, shape index: {}]   ;;  %s512_s6 = inlined_call_operand.hbm [shape: f32[2,32,64], index: 6, kind: input, shape index: {}]   ;;  %s513_s7 = inlined_call_operand.vmem [shape: f32[1,64], index: 7, kind: input, shape index: {}]   ;;  %s514_s8 = inlined_call_operand.hbm [shape: f32[2,64], index: 8, kind: output, shape index: {}]  }
   0x1   :  { %14 = vsyncpa [#allocation4], 0  ;;  %s31_s29 = sshll.u32 %s512_s6, 4  ;;  %s380_s30 = smov [#allocation2]   ;;  %s32_s29 = int_to_ptr.hbm [resolvable:$true] %s31_s29 }
   0x2   :  { %s33_s9 = sshll.u32 %s380_s30, 4  ;;  %s381_s10 = smov 128   ;;  %s34_s9 = int_to_ptr.vmem [resolvable:$true] %s33_s9 }
   0x3   :  { %s382_s11 = smov 8  }
   0x4   :  { %39 = dma.hbm_to_vmem [thread:$0]  %s32_s29, 1024, %s34_s9, [#allocation3], %s381_s10, %s381_s10, %s382_s11  }
   0x5   :  { %376 = dma.done.wait [#allocation3], 1024  }
   0x6   :  { %377 = vsyncadd [#allocation3], 4294966272  ;;  %v51_v0 = vld [vmem:[%s508_s2 + $0x18] sm:$0xff]  ;;  %v50_v1 = vld [vmem:[%s508_s2 + $0x10] sm:$0xff]  ;;  %vm56_vm0 = vcmask 261120   ;;  %vm129_vm1 = vcmask 15360  }
   0x7   :  { %75 = vmatpush.msra.mxu0 %v51_v0  ;;  %v49_v2 = vld [vmem:[%s508_s2 + $0x8] sm:$0xff]  ;;  %v91_v3 = vld [vmem:[%s510_s4 + $0x18] sm:$0xff]  ;;  %v48_v4 = vld [vmem:[%s508_s2] sm:$0xff]  ;;  %v383_v28 = vmov 1   ;;  %v384_v29 = vmov 0   ;;  %vm229_vm2 = vcmask 1041409  }
   0x8   :  { %114 = vmatpush.msra.mxu1 %v91_v3  ;;  %v452_v5 = vld [vmem:[%s506_s0] sm:$0xff]  ;;  %v459_v6 = vld [vmem:[%s506_s0 + $0x8] sm:$0xff]  ;;  %v90_v7 = vld [vmem:[%s510_s4 + $0x10] sm:$0xff]  ;;  %315 = vset.pattern.permute.xlu1 %v383_v28  ;;  %s385_s13 = smov [#allocation5]   ;;  %s292_s6 = sshll.u32 %s514_s8, 4  ;;  %vm283_vm3 = vcmask 517120   ;;  %s293_s6 = int_to_ptr.hbm [resolvable:$true] %s292_s6 }
   0x9   :  { %76 = vmatpush.msra.mxu0 %v50_v1  ;;  %v89_v8 = vld [vmem:[%s510_s4 + $0x8] sm:$0xff]  ;;  %v88_v9 = vld [vmem:[%s510_s4] sm:$0xff]  ;;  %314 = vset.pattern.permute.xlu0 %v384_v29  ;;  %v197_v3 = vld [vmem:[#allocation2 + $0x18] sm:$0xff]  ;;  %s290_s14 = sshll.u32 %s385_s13, 4  ;;  %s291_s14 = int_to_ptr.vmem [resolvable:$true] %s290_s14 }
   0xa   :  { %115 = vmatpush.msra.mxu1 %v90_v7  ;;  %v317_v10 = vld [vmem:[%s509_s3] ss:$0 sm:$0xff]  ;;  %v126_v26 = vld [vmem:[%s507_s1 + $0x8] sm:$0xff]  ;;  %270 = vmatpush.msra.mxu3 %v197_v3  ;;  %v196_v7 = vld [vmem:[#allocation2 + $0x10] sm:$0xff] }
   0xb   :  { %77 = vmatpush.msra.mxu0 %v49_v2  ;;  %v318_v17 = vld [vmem:[%s511_s5] ss:$0 sm:$0xff]  ;;  %v226_v2 = vld [vmem:[#allocation2 + $0x38] sm:$0xff] }
   0xc   :  { %116 = vmatpush.msra.mxu1 %v89_v8  ;;  %v125_v19 = vld [vmem:[%s507_s1] sm:$0xff]  ;;  %245 = vmatpush.msra.mxu2 %v226_v2  ;;  %v224_v8 = vld [vmem:[#allocation2 + $0x28] sm:$0xff] }
   0xd   :  { %78 = vmatpush.msra.mxu0 %v48_v4  ;;  %v225_v4 = vld [vmem:[#allocation2 + $0x30] sm:$0xff]  ;;  %271 = vmatpush.msra.mxu3 %v196_v7 }
   0xe   :  { %302 = vmatmul.msk.f32.vlgmr.msra.gmra.mxu0 %vm56_vm0, %v452_v5  ;;  %117 = vmatpush.msra.mxu1 %v88_v9  ;;  %v195_v9 = vld [vmem:[#allocation2 + $0x8] sm:$0xff] }
   0xf   :  { %246 = vmatpush.msra.mxu2 %v225_v4  ;;  %272 = vmatpush.msra.mxu3 %v195_v9 }
  0x11   :  { %247 = vmatpush.msra.mxu2 %v224_v8 }
  0x16   :  { %303 = vmatmul.msk.f32.gmra.mxu0 %vm56_vm0, %v459_v6 }
  0x8b   :  { %v80_v11 = vpop.f32.mrf.mxu0 }
  0x8c   :  { %v81_v12 = vadd.f32 %v317_v10, %v80_v11  ;;  %v194_v11 = vld [vmem:[#allocation2] sm:$0xff] }
  0x8d   :  { %273 = vmatpush.msra.mxu3 %v194_v11 }
  0x8e   :  { %v86_v13 = vmax.f32 %v81_v12, 0.0 }
  0x90   :  { %304 = vmatmul.msk.f32.vlgmr.msra.gmra.mxu1 %vm56_vm0, %v86_v13 }
  0x93   :  { %v83_v14 = vpop.f32.mrf.mxu0 }
  0x94   :  { %v84_v15 = vadd.f32 %v317_v10, %v83_v14  ;;  %v223_v10 = vld [vmem:[#allocation2 + $0x20] sm:$0xff] }
  0x95   :  { %248 = vmatpush.msra.mxu2 %v223_v10 }
  0x96   :  { %v87_v16 = vmax.f32 %v84_v15, 0.0 }
  0x98   :  { %305 = vmatmul.msk.f32.gmra.mxu1 %vm56_vm0, %v87_v16 }
 0x10d   :  { %v119_v18 = vpop.f32.mrf.mxu1 }
 0x10e   :  { %v120_v20 = vadd.f32 %v318_v17, %v119_v18 }
 0x110   :  { %v127_v21 = vadd.f32 %v125_v19, %v120_v20 }
 0x112   :  { %v130_v22 = vsel %vm129_vm1, %v127_v21, -inf }
 0x113   :  { %v131_v23 = vrot.slane %v130_v22, 4 }
 0x115   :  { %v132_v24 = vmax.f32 %v130_v22, %v131_v23  ;;  %v122_v25 = vpop.f32.mrf.mxu1 }
 0x116   :  { %v123_v27 = vadd.f32 %v318_v17, %v122_v25 }
 0x117   :  { %v133_v30 = vrot.slane %v132_v24, 2 }
 0x118   :  { %v128_v31 = vadd.f32 %v126_v26, %v123_v27 }
 0x119   :  { %v134_v32 = vmax.f32 %v132_v24, %v133_v30 }
 0x11a   :  { %v137_v33 = vsel %vm129_vm1, %v128_v31, -inf }
 0x11b   :  { %v135_v34 = vrot.slane %v134_v32, 1  ;;  %v138_v35 = vrot.slane %v137_v33, 4 }
 0x11d   :  { %v136_v36 = vmax.f32 %v134_v32, %v135_v34  ;;  %v139_v37 = vmax.f32 %v137_v33, %v138_v35 }
 0x11f   :  { %v144_v38 = vsub.f32 %v127_v21, %v136_v36  ;;  %v140_v39 = vrot.slane %v139_v37, 2 }
 0x121   :  { %v146_v40 = vmul.f32 1.442695, %v144_v38  ;;  %v141_v41 = vmax.f32 %v139_v37, %v140_v39 }
 0x123   :  { %320 = vpow2.f32 %v146_v40  ;;  %v142_v42 = vrot.slane %v141_v41, 1 }
 0x125   :  { %v143_v43 = vmax.f32 %v141_v41, %v142_v42 }
 0x127   :  { %v145_v44 = vsub.f32 %v128_v31, %v143_v43 }
 0x129   :  { %v321_v45 = vpop.eup %320  ;;  %v148_v46 = vmul.f32 1.442695, %v145_v44 }
 0x12a   :  { %v150_v47 = vsel %vm129_vm1, %v321_v45, 0.0 }
 0x12b   :  { %v151_v48 = vrot.slane %v150_v47, 4  ;;  %322 = vpow2.f32 %v148_v46 }
 0x12d   :  { %v152_v49 = vadd.f32 %v151_v48, %v150_v47  ;;  %v319_v48 = vld [vmem:[%s513_s7] ss:$0 sm:$0xff] }
 0x12f   :  { %v153_v50 = vrot.slane %v152_v49, 2 }
 0x131   :  { %v323_v51 = vpop.eup %322  ;;  %v154_v52 = vadd.f32 %v153_v50, %v152_v49 }
 0x132   :  { %v157_v53 = vsel %vm129_vm1, %v323_v51, 0.0 }
 0x133   :  { %v158_v54 = vrot.slane %v157_v53, 4  ;;  %v155_v55 = vrot.slane %v154_v52, 1 }
 0x135   :  { %v159_v56 = vadd.f32 %v158_v54, %v157_v53  ;;  %v156_v57 = vadd.f32 %v155_v55, %v154_v52 }
 0x137   :  { %324 = vrcp.f32 %v156_v57  ;;  %v160_v58 = vrot.slane %v159_v56, 2 }
 0x139   :  { %v161_v59 = vadd.f32 %v160_v58, %v159_v56 }
 0x13b   :  { %v162_v60 = vrot.slane %v161_v59, 1 }
 0x13d   :  { %v325_v61 = vpop.eup %324  ;;  %v163_v62 = vadd.f32 %v162_v60, %v161_v59 }
 0x13e   :  { %v166_v63 = vmul.f32 %v325_v61, %v321_v45 }
 0x13f   :  { %326 = vrcp.f32 %v163_v62 }
 0x140   :  { %199 = vperm.xlu1 %315, %v166_v63   ;;  %170 = vperm.xlu0 %314, %v166_v63  }
 0x145   :  { %v327_v0 = vpop.eup %326 }
 0x146   :  { %v167_v1 = vmul.f32 %v327_v0, %v323_v51 }
 0x148   :  { %203 = vperm.xlu1 %315, %v167_v1   ;;  %175 = vperm.xlu0 %314, %v167_v1  }
 0x150   :  { %316 = vset.pattern.permute.xlu0 %v383_v28 }
 0x1b2   :  { %v200_v12 = vpop.permute.xlu1 %199  ;;  %v171_v13 = vpop.permute.xlu0 %170 }
 0x1b3   :  { %v206_v14 = vmul.f32 %v200_v12, %v452_v5  ;;  %v178_v15 = vmul.f32 %v171_v13, %v452_v5 }
 0x1b5   :  { %v208_v16 = vsel %vm56_vm0, %v206_v14, 0.0  ;;  %v180_v17 = vsel %vm56_vm0, %v178_v15, 0.0 }
 0x1b6   :  { %v209_v18 = vrot.slane %v208_v16, 4  ;;  %v181_v19 = vrot.slane %v180_v17, 4 }
 0x1b8   :  { %v210_v20 = vadd.f32 %v209_v18, %v208_v16  ;;  %v182_v21 = vadd.f32 %v181_v19, %v180_v17 }
 0x1ba   :  { %v204_v22 = vpop.permute.xlu1 %203  ;;  %v176_v23 = vpop.permute.xlu0 %175  ;;  %v211_v26 = vrot.slane %v210_v20, 2  ;;  %v183_v27 = vrot.slane %v182_v21, 2 }
 0x1bb   :  { %v207_v24 = vmul.f32 %v204_v22, %v459_v6  ;;  %v179_v25 = vmul.f32 %v176_v23, %v459_v6 }
 0x1bc   :  { %v212_v31 = vadd.f32 %v211_v26, %v210_v20  ;;  %v184_v32 = vadd.f32 %v183_v27, %v182_v21 }
 0x1bd   :  { %v215_v28 = vsel %vm56_vm0, %v207_v24, 0.0  ;;  %v187_v5 = vsel %vm56_vm0, %v179_v25, 0.0 }
 0x1be   :  { %v216_v29 = vrot.slane %v215_v28, 4  ;;  %v188_v30 = vrot.slane %v187_v5, 4  ;;  %v213_v37 = vrot.slane %v212_v31, 1  ;;  %v185_v38 = vrot.slane %v184_v32, 1 }
 0x1c0   :  { %v217_v33 = vadd.f32 %v216_v29, %v215_v28  ;;  %v189_v34 = vadd.f32 %v188_v30, %v187_v5  ;;  %v214_v42 = vadd.f32 %v213_v37, %v212_v31  ;;  %v186_v44 = vadd.f32 %v185_v38, %v184_v32 }
 0x1c2   :  { %v218_v35 = vrot.slane %v217_v33, 2  ;;  %v190_v36 = vrot.slane %v189_v34, 2 }
 0x1c4   :  { %v219_v39 = vadd.f32 %v218_v35, %v217_v33  ;;  %v191_v40 = vadd.f32 %v190_v36, %v189_v34 }
 0x1c6   :  { %v220_v41 = vrot.slane %v219_v39, 1  ;;  %v192_v6 = vrot.slane %v191_v40, 1 }
 0x1c8   :  { %v221_v43 = vadd.f32 %v220_v41, %v219_v39  ;;  %v193_v45 = vadd.f32 %v192_v6, %v191_v40 }
 0x1ca   :  { %v230_v46 = vsel %vm229_vm2, %v221_v43, %v214_v42  ;;  %v255_v47 = vsel %vm229_vm2, %v193_v45, %v186_v44 }
 0x1cb   :  { %306 = vmatmul.msk.f32.vlgmr.msra.gmra.mxu2 %vm56_vm0, %v230_v46  ;;  %307 = vmatmul.msk.f32.vlgmr.msra.gmra.mxu3 %vm56_vm0, %v255_v47 }
 0x24e   :  { %v250_v49 = vpop.f32.mrf.mxu2  ;;  %v275_v50 = vpop.f32.mrf.mxu3 }
 0x24f   :  { %v276_v51 = vadd.f32 %v275_v50, %v250_v49 }
 0x251   :  { %v282_v52 = vadd.f32 %v319_v48, %v276_v51 }
 0x253   :  { %284 = vst.msk [vmem:[#allocation5] sm:$0x3] %vm283_vm3, %v282_v52 }
 0x254   :  { %295 = dma.vmem_to_hbm [thread:$0]  %s291_s14, 32, %s293_s6, [#allocation4]  }
 0x255   :  { %378 = dma.done.wait [#allocation4], 32  }
 0x256   :  { %379 = vsyncadd [#allocation4], 4294967264 }
 0x257   :  { %300 = vsyncpa [#allocation3], 1 }
 0x258   :  { %301 = vsyncpa [#allocation4], 1 }

</bundles_post_ra>
